<compile_context>
chip_gen: v7x
topology: tpu7x:2x2x1
jax: 0.10.0
libtpu: 0.0.40
codegen_flags: <defaults>
</compile_context>

<pallas_src>
import jax
import jax.numpy as jnp
from jax import lax
from jax.experimental import pallas as pl
from jax.experimental.pallas import tpu as pltpu

KH = KW = 3  # kernel size fixed by the module default


def _round_up(a, b):
    return (a + b - 1) // b * b


def _make_kernel(H, W, Cin, CP, NB):
    HW = H * W

    def kernel(x_ref, w_ref, o_ref, taps_ref):
        # x_ref:    (NB, Cin, H*W)   NB images, lane axis = H*W (lane-dense)
        # w_ref:    (TCO, 9*CP)      packed weights for this Cout tile
        # o_ref:    (NB, TCO, H*W)   lane-dense output slab
        # taps_ref: (9*CP, NB*H*W)   VMEM scratch: im2col-lite matrix
        co_tile = pl.program_id(1)

        # Taps depend only on the image block, not on the Cout tile -> rebuild
        # only when the image block changes.  NOTE: this caching relies on grid
        # order (N outer, co inner) and on the co axis staying "arbitrary";
        # do not reorder the grid or mark co parallel.
        @pl.when(co_tile == 0)
        def _build_taps():
            if CP != Cin:
                # Zero once per image block so the sublane-pad rows of each tap
                # slab are clean (their weight rows are zero, but uninitialized
                # VMEM could hold NaN and NaN*0 = NaN).
                taps_ref[...] = jnp.zeros_like(taps_ref)

            # Column masks built once at (1, HW) and broadcast over Cin.
            wpos = lax.broadcasted_iota(jnp.int32, (1, HW), 1) % W
            not_last = wpos < (W - 1)    # zeroes col W-1 -> source for dw = -1
            not_first = wpos > 0         # zeroes col 0   -> source for dw = +1

            for n in range(NB):
                x = x_ref[n]                                    # (Cin, HW)
                zero = jnp.zeros_like(x)
                x_l = jnp.where(not_last, x, zero)
                x_r = jnp.where(not_first, x, zero)
                cols = slice(n * HW, (n + 1) * HW)
                for kh in range(KH):          # dh = kh-1 : circular along H
                    for kw in range(KW):      # dw = kw-1 : zero pad along W
                        dh, dw = kh - 1, kw - 1
                        src = x if dw == 0 else (x_l if dw == -1 else x_r)
                        # tap[ci, h*W+w] = x[ci, (h+dh) mod H, w+dw] (0 outside W)
                        # = one circular roll of the flattened lane axis (XLU);
                        # the pre-masked edge column travels with the roll.
                        shift = (-(dh * W + dw)) % HW           # static int
                        t = pltpu.roll(src, shift, axis=1) if shift else src
                        r0 = (kh * KW + kw) * CP                # sublane-aligned
                        taps_ref[r0:r0 + Cin, cols] = t

        # One wide-K MXU matmul at default precision (single-pass bf16 on the
        # MXU, f32 accumulation) for the whole image batch / Cout tile.
        acc = jnp.dot(w_ref[...], taps_ref[...],
                      preferred_element_type=jnp.float32)        # (TCO, NB*HW)
        for n in range(NB):
            o_ref[n] = acc[:, n * HW:(n + 1) * HW].astype(o_ref.dtype)

    return kernel


def ring_conv(x_nchw, w_oihw):
    """RingConv forward: circular pad H, zero pad W, 3x3 conv, stride 1, no bias.

    x_nchw: (N, Cin, H, W)
    w_oihw: (Cout, Cin, 3, 3)
    returns: (N, Cout, H, W)
    """
    N, Cin, H, W = x_nchw.shape
    Cout = w_oihw.shape[0]
    HW = H * W
    itemsize = jnp.dtype(x_nchw.dtype).itemsize
    SUB = 32 // itemsize           # sublane pack: 8 (f32) / 16 (bf16) / 32 (i8)
    CP = _round_up(Cin, SUB)       # rows per tap slab (aligned scratch stores)
    K = KH * KW * CP

    # Pre-pack weights once: (Cout, ci, kh, kw) -> (Cout, 9*CP).  K ordering
    # matches the tap stacking; the Cin->CP pad rows are zero.
    w_r = jnp.transpose(w_oihw, (0, 2, 3, 1))                   # (Cout,kh,kw,ci)
    if CP != Cin:
        w_r = jnp.pad(w_r, ((0, 0), (0, 0), (0, 0), (0, CP - Cin)))
    Cout_pad = _round_up(Cout, SUB)
    w_packed = w_r.reshape(Cout, K)
    if Cout_pad != Cout:
        w_packed = jnp.pad(w_packed, ((0, Cout_pad - Cout), (0, 0)))

    # Cout tiling: 256 matches the v6e/v7x MXU tile, 128 matches v5e; for small
    # channel counts the (sublane-padded) Cout itself is the tile.
    if Cout_pad % 256 == 0:
        TCO = 256
    elif Cout_pad % 128 == 0:
        TCO = 128
    else:
        TCO = Cout_pad
    n_co = Cout_pad // TCO

    # Batch blocking: fuse NB images into the lane axis of the matmul, bounded
    # so the taps scratch stays small (well under the 16 MiB v5e scoped-VMEM
    # default and v7x's 64 MiB physical VMEM).
    taps_img_bytes = K * HW * itemsize
    NB = 1
    for cand in range(min(N, 8), 0, -1):
        if N % cand == 0 and cand * taps_img_bytes <= (8 << 20):
            NB = cand
            break
    # TODO(synk): for large Cin*H*W (taps scratch beyond a few MiB, esp. on
    # v7x's 64 MiB VMEM) add a spatial H*W grid axis with a +-W lane halo (or
    # tile K with an f32 accumulator) instead of holding the full im2col slab.

    # Free (row-major) reshape: NCHW -> (N, Cin, H*W).  Lane axis = H*W.
    x_flat = x_nchw.reshape(N, Cin, HW)

    kernel = _make_kernel(H, W, Cin, CP, NB)

    cost = pl.CostEstimate(
        flops=2 * N * Cout * KH * KW * Cin * HW,
        transcendentals=0,
        bytes_accessed=(x_flat.size + w_packed.size + N * Cout_pad * HW)
        * itemsize,
    )

    out_flat = pl.pallas_call(
        kernel,
        out_shape=jax.ShapeDtypeStruct((N, Cout_pad, HW), x_nchw.dtype),
        grid_spec=pltpu.PrefetchScalarGridSpec(
            num_scalar_prefetch=0,
            grid=(N // NB, n_co),
            in_specs=[
                # Image block for this batch step; block index is constant
                # across co, so it is not re-DMA'd per Cout tile.
                pl.BlockSpec((NB, Cin, HW), lambda n, c: (n, 0, 0)),
                pl.BlockSpec((TCO, K), lambda n, c: (c, 0)),
            ],
            out_specs=pl.BlockSpec((NB, TCO, HW), lambda n, c: (n, c, 0)),
            scratch_shapes=[pltpu.VMEM((K, NB * HW), x_nchw.dtype)],
        ),
        compiler_params=pltpu.CompilerParams(
            # N axis independent -> megacore / dual-TC parallel; Cout axis
            # reuses the taps scratch -> must stay "arbitrary".
            dimension_semantics=("parallel", "arbitrary")),
        cost_estimate=cost,
    )(x_flat, w_packed)

    # Drop Cout padding (if any); free reshape back to NCHW.
    return out_flat[:, :Cout, :].reshape(N, Cout, H, W)


def ring_conv_ref(x_nchw, w_oihw):
    """Pure-JAX reference identical to the PyTorch forward (full f32)."""
    x = jnp.concatenate([x_nchw[:, :, -1:, :], x_nchw, x_nchw[:, :, :1, :]],
                        axis=2)  # circular pad along H
    return lax.conv_general_dilated(
        x, w_oihw, window_strides=(1, 1), padding=[(0, 0), (1, 1)],
        dimension_numbers=("NCHW", "OIHW", "NCHW"),
        precision=lax.Precision.HIGHEST)


if __name__ == "__main__":
    key = jax.random.PRNGKey(0)
    k_x, k_w = jax.random.split(key)

    N, Cin, Cout, H, W = 2, 4, 8, 16, 16
    x = jax.random.normal(k_x, (N, Cin, H, W), dtype=jnp.float32)
    w = jax.random.normal(k_w, (Cout, Cin, KH, KW), dtype=jnp.float32) * 0.1

    out = jax.block_until_ready(ring_conv(x, w))
    ref = jax.block_until_ready(ring_conv_ref(x, w))

    assert out.shape == (N, Cout, H, W)
    # Kernel matmul runs at default precision (single-pass bf16 MXU, f32
    # accumulation); compare against the f32 reference with a bf16 tolerance.
    assert jnp.allclose(out, ref, atol=5e-2, rtol=5e-2), (
        float(jnp.max(jnp.abs(out - ref))))
    print("KERNEL_OK")
</pallas_src>

<mosaic_0001>
module attributes {stable_mosaic.version = 11 : i64} {
  func.func @kernel(%arg0: i32, %arg1: i32, %arg2: memref<2x4x256xf32, #tpu.memory_space<vmem>>, %arg3: memref<8x72xf32, #tpu.memory_space<vmem>>, %arg4: memref<2x8x256xf32, #tpu.memory_space<vmem>>, %arg5: memref<72x512xf32, #tpu.memory_space<vmem>>) attributes {dimension_semantics = [#tpu.dimension_semantics<parallel>, #tpu.dimension_semantics<arbitrary>], iteration_bounds = array<i64: 1, 1>, scalar_prefetch = 0 : i64, scratch_operands = 1 : i64, tpu.core_type = #tpu.core_type<tc>, window_params = [{transform_indices = @transform_0, window_bounds = array<i64: 2, 4, 256>}, {transform_indices = @transform_1, window_bounds = array<i64: 8, 72>}, {transform_indices = @transform_2, window_bounds = array<i64: 2, 8, 256>}]} {
    %c0_i32 = arith.constant 0 : i32
    %0 = arith.cmpi eq, %arg1, %c0_i32 : i32
    %1 = arith.extui %0 : i1 to i32
    %c0_i32_0 = arith.constant 0 : i32
    %2 = arith.cmpi ne, %1, %c0_i32_0 : i32
    scf.if %2 {
      %cst_9 = arith.constant 0.000000e+00 : f32
      %14 = vector.broadcast %cst_9 : f32 to vector<72x512xf32>
      %c0_10 = arith.constant 0 : index
      %c0_11 = arith.constant 0 : index
      %15 = vector.load %arg5[%c0_10, %c0_11] : memref<72x512xf32, #tpu.memory_space<vmem>>, vector<72x512xf32>
      tpu.vector_store %arg5[%c0_10, %c0_11], %14 {strides = array<i32>} : memref<72x512xf32, #tpu.memory_space<vmem>>, vector<72x512xf32>,
      %16 = tpu.iota {dimensions = array<i32: 1>} : vector<1x256xi32>
      %c16_i32 = arith.constant 16 : i32
      %c0_i32_12 = arith.constant 0 : i32
      %17 = arith.cmpi eq, %c16_i32, %c0_i32_12 : i32
      %c1_i32 = arith.constant 1 : i32
      %18 = arith.select %17, %c1_i32, %c16_i32 : i32
      %19 = vector.broadcast %18 : i32 to vector<1x256xi32>
      %20 = arith.remsi %16, %19 : vector<1x256xi32>
      %c0_i32_13 = arith.constant 0 : i32
      %21 = vector.broadcast %c0_i32_13 : i32 to vector<1x256xi32>
      %22 = arith.cmpi ne, %20, %21 : vector<1x256xi32>
      %c0_i32_14 = arith.constant 0 : i32
      %23 = vector.broadcast %c0_i32_14 : i32 to vector<1x256xi32>
      %24 = arith.cmpi slt, %20, %23 : vector<1x256xi32>
      %c0_i32_15 = arith.constant 0 : i32
      %25 = arith.cmpi slt, %18, %c0_i32_15 : i32
      %26 = vector.broadcast %25 : i1 to vector<1x256xi1>
      %27 = vector.broadcast %26 : vector<1x256xi1> to vector<1x256xi1>
      %28 = arith.xori %24, %27 : vector<1x256xi1>
      %29 = arith.andi %28, %22 : vector<1x256xi1>
      %30 = vector.broadcast %18 : i32 to vector<1x256xi32>
      %31 = arith.addi %20, %30 : vector<1x256xi32>
      %32 = arith.select %29, %31, %20 : vector<1x256xi1>, vector<1x256xi32>
      %c15_i32 = arith.constant 15 : i32
      %33 = vector.broadcast %c15_i32 : i32 to vector<1x256xi32>
      %34 = arith.cmpi slt, %32, %33 : vector<1x256xi32>
      %c0_i32_16 = arith.constant 0 : i32
      %35 = vector.broadcast %c0_i32_16 : i32 to vector<1x256xi32>
      %36 = arith.cmpi sgt, %32, %35 : vector<1x256xi32>
      %c0_17 = arith.constant 0 : index
      %c0_18 = arith.constant 0 : index
      %c0_19 = arith.constant 0 : index
      %37 = vector.load %arg2[%c0_17, %c0_18, %c0_19] : memref<2x4x256xf32, #tpu.memory_space<vmem>>, vector<1x4x256xf32>
      %38 = vector.shape_cast %37 : vector<1x4x256xf32> to vector<4x256xf32>
      %cst_20 = arith.constant 0.000000e+00 : f32
      %39 = vector.broadcast %cst_20 : f32 to vector<4x256xf32>
      %40 = vector.shape_cast %34 : vector<1x256xi1> to vector<1x256xi1>
      %41 = vector.broadcast %40 : vector<1x256xi1> to vector<4x256xi1>
      %42 = arith.select %41, %38, %39 : vector<4x256xi1>, vector<4x256xf32>
      %43 = vector.shape_cast %36 : vector<1x256xi1> to vector<1x256xi1>
      %44 = vector.broadcast %43 : vector<1x256xi1> to vector<4x256xi1>
      %45 = arith.select %44, %38, %39 : vector<4x256xi1>, vector<4x256xf32>
      %c17_i32 = arith.constant 17 : i32
      %46 = tpu.dynamic_rotate %42 by %c17_i32 dim 1 : vector<4x256xf32>, i32 -> vector<4x256xf32>
      %c0_21 = arith.constant 0 : index
      %c0_22 = arith.constant 0 : index
      %47 = vector.load %arg5[%c0_21, %c0_22] : memref<72x512xf32, #tpu.memory_space<vmem>>, vector<4x256xf32>
      tpu.vector_store %arg5[%c0_21, %c0_22], %46 {strides = array<i32>} : memref<72x512xf32, #tpu.memory_space<vmem>>, vector<4x256xf32>,
      %c16_i32_23 = arith.constant 16 : i32
      %48 = tpu.dynamic_rotate %38 by %c16_i32_23 dim 1 : vector<4x256xf32>, i32 -> vector<4x256xf32>
      %c8 = arith.constant 8 : index
      %c0_24 = arith.constant 0 : index
      %49 = vector.load %arg5[%c8, %c0_24] : memref<72x512xf32, #tpu.memory_space<vmem>>, vector<4x256xf32>
      tpu.vector_store %arg5[%c8, %c0_24], %48 {strides = array<i32>} : memref<72x512xf32, #tpu.memory_space<vmem>>, vector<4x256xf32>,
      %c15_i32_25 = arith.constant 15 : i32
      %50 = tpu.dynamic_rotate %45 by %c15_i32_25 dim 1 : vector<4x256xf32>, i32 -> vector<4x256xf32>
      %c16 = arith.constant 16 : index
      %c0_26 = arith.constant 0 : index
      %51 = vector.load %arg5[%c16, %c0_26] : memref<72x512xf32, #tpu.memory_space<vmem>>, vector<4x256xf32>
      tpu.vector_store %arg5[%c16, %c0_26], %50 {strides = array<i32>} : memref<72x512xf32, #tpu.memory_space<vmem>>, vector<4x256xf32>,
      %c1_i32_27 = arith.constant 1 : i32
      %52 = tpu.dynamic_rotate %42 by %c1_i32_27 dim 1 : vector<4x256xf32>, i32 -> vector<4x256xf32>
      %c24 = arith.constant 24 : index
      %c0_28 = arith.constant 0 : index
      %53 = vector.load %arg5[%c24, %c0_28] : memref<72x512xf32, #tpu.memory_space<vmem>>, vector<4x256xf32>
      tpu.vector_store %arg5[%c24, %c0_28], %52 {strides = array<i32>} : memref<72x512xf32, #tpu.memory_space<vmem>>, vector<4x256xf32>,
      %c32 = arith.constant 32 : index
      %c0_29 = arith.constant 0 : index
      %54 = vector.load %arg5[%c32, %c0_29] : memref<72x512xf32, #tpu.memory_space<vmem>>, vector<4x256xf32>
      tpu.vector_store %arg5[%c32, %c0_29], %38 {strides = array<i32>} : memref<72x512xf32, #tpu.memory_space<vmem>>, vector<4x256xf32>,
      %c255_i32 = arith.constant 255 : i32
      %55 = tpu.dynamic_rotate %45 by %c255_i32 dim 1 : vector<4x256xf32>, i32 -> vector<4x256xf32>
      %c40 = arith.constant 40 : index
      %c0_30 = arith.constant 0 : index
      %56 = vector.load %arg5[%c40, %c0_30] : memref<72x512xf32, #tpu.memory_space<vmem>>, vector<4x256xf32>
      tpu.vector_store %arg5[%c40, %c0_30], %55 {strides = array<i32>} : memref<72x512xf32, #tpu.memory_space<vmem>>, vector<4x256xf32>,
      %c241_i32 = arith.constant 241 : i32
      %57 = tpu.dynamic_rotate %42 by %c241_i32 dim 1 : vector<4x256xf32>, i32 -> vector<4x256xf32>
      %c48 = arith.constant 48 : index
      %c0_31 = arith.constant 0 : index
      %58 = vector.load %arg5[%c48, %c0_31] : memref<72x512xf32, #tpu.memory_space<vmem>>, vector<4x256xf32>
      tpu.vector_store %arg5[%c48, %c0_31], %57 {strides = array<i32>} : memref<72x512xf32, #tpu.memory_space<vmem>>, vector<4x256xf32>,
      %c240_i32 = arith.constant 240 : i32
      %59 = tpu.dynamic_rotate %38 by %c240_i32 dim 1 : vector<4x256xf32>, i32 -> vector<4x256xf32>
      %c56 = arith.constant 56 : index
      %c0_32 = arith.constant 0 : index
      %60 = vector.load %arg5[%c56, %c0_32] : memref<72x512xf32, #tpu.memory_space<vmem>>, vector<4x256xf32>
      tpu.vector_store %arg5[%c56, %c0_32], %59 {strides = array<i32>} : memref<72x512xf32, #tpu.memory_space<vmem>>, vector<4x256xf32>,
      %c239_i32 = arith.constant 239 : i32
      %61 = tpu.dynamic_rotate %45 by %c239_i32 dim 1 : vector<4x256xf32>, i32 -> vector<4x256xf32>
      %c64 = arith.constant 64 : index
      %c0_33 = arith.constant 0 : index
      %62 = vector.load %arg5[%c64, %c0_33] : memref<72x512xf32, #tpu.memory_space<vmem>>, vector<4x256xf32>
      tpu.vector_store %arg5[%c64, %c0_33], %61 {strides = array<i32>} : memref<72x512xf32, #tpu.memory_space<vmem>>, vector<4x256xf32>,
      %c1_34 = arith.constant 1 : index
      %c0_35 = arith.constant 0 : index
      %c0_36 = arith.constant 0 : index
      %63 = vector.load %arg2[%c1_34, %c0_35, %c0_36] : memref<2x4x256xf32, #tpu.memory_space<vmem>>, vector<1x4x256xf32>
      %64 = vector.shape_cast %63 : vector<1x4x256xf32> to vector<4x256xf32>
      %cst_37 = arith.constant 0.000000e+00 : f32
      %65 = vector.broadcast %cst_37 : f32 to vector<4x256xf32>
      %66 = vector.shape_cast %34 : vector<1x256xi1> to vector<1x256xi1>
      %67 = vector.broadcast %66 : vector<1x256xi1> to vector<4x256xi1>
      %68 = arith.select %67, %64, %65 : vector<4x256xi1>, vector<4x256xf32>
      %69 = vector.shape_cast %36 : vector<1x256xi1> to vector<1x256xi1>
      %70 = vector.broadcast %69 : vector<1x256xi1> to vector<4x256xi1>
      %71 = arith.select %70, %64, %65 : vector<4x256xi1>, vector<4x256xf32>
      %c17_i32_38 = arith.constant 17 : i32
      %72 = tpu.dynamic_rotate %68 by %c17_i32_38 dim 1 : vector<4x256xf32>, i32 -> vector<4x256xf32>
      %c0_39 = arith.constant 0 : index
      %c256 = arith.constant 256 : index
      %73 = vector.load %arg5[%c0_39, %c256] : memref<72x512xf32, #tpu.memory_space<vmem>>, vector<4x256xf32>
      tpu.vector_store %arg5[%c0_39, %c256], %72 {strides = array<i32>} : memref<72x512xf32, #tpu.memory_space<vmem>>, vector<4x256xf32>,
      %c16_i32_40 = arith.constant 16 : i32
      %74 = tpu.dynamic_rotate %64 by %c16_i32_40 dim 1 : vector<4x256xf32>, i32 -> vector<4x256xf32>
      %c8_41 = arith.constant 8 : index
      %c256_42 = arith.constant 256 : index
      %75 = vector.load %arg5[%c8_41, %c256_42] : memref<72x512xf32, #tpu.memory_space<vmem>>, vector<4x256xf32>
      tpu.vector_store %arg5[%c8_41, %c256_42], %74 {strides = array<i32>} : memref<72x512xf32, #tpu.memory_space<vmem>>, vector<4x256xf32>,
      %c15_i32_43 = arith.constant 15 : i32
      %76 = tpu.dynamic_rotate %71 by %c15_i32_43 dim 1 : vector<4x256xf32>, i32 -> vector<4x256xf32>
      %c16_44 = arith.constant 16 : index
      %c256_45 = arith.constant 256 : index
      %77 = vector.load %arg5[%c16_44, %c256_45] : memref<72x512xf32, #tpu.memory_space<vmem>>, vector<4x256xf32>
      tpu.vector_store %arg5[%c16_44, %c256_45], %76 {strides = array<i32>} : memref<72x512xf32, #tpu.memory_space<vmem>>, vector<4x256xf32>,
      %c1_i32_46 = arith.constant 1 : i32
      %78 = tpu.dynamic_rotate %68 by %c1_i32_46 dim 1 : vector<4x256xf32>, i32 -> vector<4x256xf32>
      %c24_47 = arith.constant 24 : index
      %c256_48 = arith.constant 256 : index
      %79 = vector.load %arg5[%c24_47, %c256_48] : memref<72x512xf32, #tpu.memory_space<vmem>>, vector<4x256xf32>
      tpu.vector_store %arg5[%c24_47, %c256_48], %78 {strides = array<i32>} : memref<72x512xf32, #tpu.memory_space<vmem>>, vector<4x256xf32>,
      %c32_49 = arith.constant 32 : index
      %c256_50 = arith.constant 256 : index
      %80 = vector.load %arg5[%c32_49, %c256_50] : memref<72x512xf32, #tpu.memory_space<vmem>>, vector<4x256xf32>
      tpu.vector_store %arg5[%c32_49, %c256_50], %64 {strides = array<i32>} : memref<72x512xf32, #tpu.memory_space<vmem>>, vector<4x256xf32>,
      %c255_i32_51 = arith.constant 255 : i32
      %81 = tpu.dynamic_rotate %71 by %c255_i32_51 dim 1 : vector<4x256xf32>, i32 -> vector<4x256xf32>
      %c40_52 = arith.constant 40 : index
      %c256_53 = arith.constant 256 : index
      %82 = vector.load %arg5[%c40_52, %c256_53] : memref<72x512xf32, #tpu.memory_space<vmem>>, vector<4x256xf32>
      tpu.vector_store %arg5[%c40_52, %c256_53], %81 {strides = array<i32>} : memref<72x512xf32, #tpu.memory_space<vmem>>, vector<4x256xf32>,
      %c241_i32_54 = arith.constant 241 : i32
      %83 = tpu.dynamic_rotate %68 by %c241_i32_54 dim 1 : vector<4x256xf32>, i32 -> vector<4x256xf32>
      %c48_55 = arith.constant 48 : index
      %c256_56 = arith.constant 256 : index
      %84 = vector.load %arg5[%c48_55, %c256_56] : memref<72x512xf32, #tpu.memory_space<vmem>>, vector<4x256xf32>
      tpu.vector_store %arg5[%c48_55, %c256_56], %83 {strides = array<i32>} : memref<72x512xf32, #tpu.memory_space<vmem>>, vector<4x256xf32>,
      %c240_i32_57 = arith.constant 240 : i32
      %85 = tpu.dynamic_rotate %64 by %c240_i32_57 dim 1 : vector<4x256xf32>, i32 -> vector<4x256xf32>
      %c56_58 = arith.constant 56 : index
      %c256_59 = arith.constant 256 : index
      %86 = vector.load %arg5[%c56_58, %c256_59] : memref<72x512xf32, #tpu.memory_space<vmem>>, vector<4x256xf32>
      tpu.vector_store %arg5[%c56_58, %c256_59], %85 {strides = array<i32>} : memref<72x512xf32, #tpu.memory_space<vmem>>, vector<4x256xf32>,
      %c239_i32_60 = arith.constant 239 : i32
      %87 = tpu.dynamic_rotate %71 by %c239_i32_60 dim 1 : vector<4x256xf32>, i32 -> vector<4x256xf32>
      %c64_61 = arith.constant 64 : index
      %c256_62 = arith.constant 256 : index
      %88 = vector.load %arg5[%c64_61, %c256_62] : memref<72x512xf32, #tpu.memory_space<vmem>>, vector<4x256xf32>
      tpu.vector_store %arg5[%c64_61, %c256_62], %87 {strides = array<i32>} : memref<72x512xf32, #tpu.memory_space<vmem>>, vector<4x256xf32>,
    } else {
    }
    %c0 = arith.constant 0 : index
    %c0_1 = arith.constant 0 : index
    %3 = vector.load %arg3[%c0, %c0_1] : memref<8x72xf32, #tpu.memory_space<vmem>>, vector<8x72xf32>
    %c0_2 = arith.constant 0 : index
    %c0_3 = arith.constant 0 : index
    %4 = vector.load %arg5[%c0_2, %c0_3] : memref<72x512xf32, #tpu.memory_space<vmem>>, vector<72x512xf32>
    %cst = arith.constant dense<0.000000e+00> : vector<8x512xf32>
    %5 = tpu.matmul %3, %4, %cst {dimension_numbers = #tpu.dot_dimension_numbers<[1], [0], [0], [1], [0, 0, 1, 1], [], []>} : vector<8x72xf32>, vector<72x512xf32>, vector<8x512xf32> -> vector<8x512xf32>
    %6 = vector.extract_strided_slice %5 {offsets = [0, 0], sizes = [8, 256], strides = [1, 1]} : vector<8x512xf32> to vector<8x256xf32>
    %c0_4 = arith.constant 0 : index
    %c0_5 = arith.constant 0 : index
    %c0_6 = arith.constant 0 : index
    %7 = vector.load %arg4[%c0_4, %c0_5, %c0_6] : memref<2x8x256xf32, #tpu.memory_space<vmem>>, vector<1x8x256xf32>
    %8 = vector.shape_cast %7 : vector<1x8x256xf32> to vector<8x256xf32>
    %9 = vector.shape_cast %6 : vector<8x256xf32> to vector<1x8x256xf32>
    tpu.vector_store %arg4[%c0_4, %c0_5, %c0_6], %9 {strides = array<i32>} : memref<2x8x256xf32, #tpu.memory_space<vmem>>, vector<1x8x256xf32>,
    %10 = vector.extract_strided_slice %5 {offsets = [0, 256], sizes = [8, 256], strides = [1, 1]} : vector<8x512xf32> to vector<8x256xf32>
    %c1 = arith.constant 1 : index
    %c0_7 = arith.constant 0 : index
    %c0_8 = arith.constant 0 : index
    %11 = vector.load %arg4[%c1, %c0_7, %c0_8] : memref<2x8x256xf32, #tpu.memory_space<vmem>>, vector<1x8x256xf32>
    %12 = vector.shape_cast %11 : vector<1x8x256xf32> to vector<8x256xf32>
    %13 = vector.shape_cast %10 : vector<8x256xf32> to vector<1x8x256xf32>
    tpu.vector_store %arg4[%c1, %c0_7, %c0_8], %13 {strides = array<i32>} : memref<2x8x256xf32, #tpu.memory_space<vmem>>, vector<1x8x256xf32>,
    return
  }
  func.func @transform_0(%arg0: i32, %arg1: i32) -> (i32, i32, i32) {
    %c0_i32 = arith.constant 0 : i32
    %c0_i32_0 = arith.constant 0 : i32
    %c0_i32_1 = arith.constant 0 : i32
    return %arg0, %c0_i32, %c0_i32_0 : i32, i32, i32
  }
  func.func @transform_1(%arg0: i32, %arg1: i32) -> (i32, i32) {
    %c0_i32 = arith.constant 0 : i32
    %c0_i32_0 = arith.constant 0 : i32
    return %arg1, %c0_i32 : i32, i32
  }
  func.func @transform_2(%arg0: i32, %arg1: i32) -> (i32, i32, i32) {
    %c0_i32 = arith.constant 0 : i32
    %c0_i32_0 = arith.constant 0 : i32
    return %arg0, %arg1, %c0_i32 : i32, i32, i32
  }
}

</mosaic_0001>

<bundles_post_ra>
// kernel: tpu_custom_call.1
= control target key start
LH: loop header
LB: loop body
LE: loop exit
PB: predicated region body
PF: predicated region fallthrough
CT: control target
= control target key end

     0   :  { %7 = vsyncpa [#allocation4], 0  ;;  %s726_s0 = inlined_call_operand.hbm [shape: f32[2,4,256], index: 0, kind: input, shape index: {}]   ;;  %s727_s1 = inlined_call_operand.hbm [shape: f32[8,72], index: 1, kind: input, shape index: {}]   ;;  %s728_s2 = inlined_call_operand.hbm [shape: f32[2,8,256], index: 2, kind: output, shape index: {}]  }
   0x1   :  { %8 = vsyncpa [#allocation7], 0 }
   0x2   :  { %9 = vsyncpa [#allocation5], 0  ;;  %s603_s9 = smov [#allocation3]   ;;  %s531_s13 = scalar_lea.hbm %s726_s0, 256 }
   0x3   :  { %s15_s10 = sshll.u32 %s603_s9, 4  ;;  %p532_p0 = scmp.ne.s32.totalorder %s726_s0, %s531_s13  ;;  %s16_s10 = int_to_ptr.vmem [resolvable:$true] %s15_s10 }
   0x4   :  { %p535_p1 = scmp.lt.u32.totalorder %s531_s13, %s726_s0 }
   0x6   :  { %p537_p2 = pnand %p535_p1, %p532_p0 }
   0x8   :  { %540 = shalt.err (!%p537_p2)
}
   0x9   :  { %s541_s18 = scalar_lea.vmem %s16_s10, 256  ;;  %p546_p4 = scmp.lt.s32.totalorder %s16_s10, %s16_s10 }
   0xa   :  { %p542_p3 = scmp.ne.s32.totalorder %s16_s10, %s541_s18  ;;  %p547_p5 = scmp.lt.s32.totalorder %s541_s18, %s541_s18 }
   0xc   :  { %p548_p6 = por %p547_p5, %p546_p4 }
   0xe   :  { %p549_p7 = pnand %p548_p6, %p542_p3 }
  0x10   :  { %552 = shalt.err (!%p549_p7)
}
  0x11   :  { %s604_s19 = smov 128   ;;  %s605_s20 = smov 8  }
  0x12   :  { %21 = dma.hbm_to_vmem [thread:$0]  %s726_s0, 256, %s16_s10, [#allocation4], %s604_s19, %s604_s19, %s605_s20  }
  0x13   :  { %s606_s23 = smov [#allocation6]   ;;  %s553_s27 = scalar_lea.hbm %s727_s1, 128 }
  0x14   :  { %s28_s24 = sshll.u32 %s606_s23, 4  ;;  %p554_p8 = scmp.ne.s32.totalorder %s727_s1, %s553_s27  ;;  %s29_s24 = int_to_ptr.vmem [resolvable:$true] %s28_s24 }
  0x15   :  { %p557_p9 = scmp.lt.u32.totalorder %s553_s27, %s727_s1 }
  0x17   :  { %p559_p10 = pnand %p557_p9, %p554_p8 }
  0x19   :  { %562 = shalt.err (!%p559_p10)
}
  0x1a   :  { %s563_s4 = scalar_lea.vmem %s29_s24, 128  ;;  %p568_p12 = scmp.lt.s32.totalorder %s29_s24, %s29_s24 }
  0x1b   :  { %p564_p11 = scmp.ne.s32.totalorder %s29_s24, %s563_s4  ;;  %p569_p13 = scmp.lt.s32.totalorder %s563_s4, %s563_s4 }
  0x1d   :  { %p570_p0 = por %p569_p13, %p568_p12 }
  0x1f   :  { %p571_p1 = pnand %p570_p0, %p564_p11 }
  0x21   :  { %574 = shalt.err (!%p571_p1)
}
  0x22   :  { %31 = dma.hbm_to_vmem [thread:$0]  %s727_s1, 128, %s29_s24, [#allocation7]  }
  0x23   :  { %597 = dma.done.wait [#allocation4], 256  }
  0x24   :  { %598 = vsyncadd [#allocation4], 4294967040 }
  0x25   :  { %599 = dma.done.wait [#allocation7], 128  }
  0x26   :  { %600 = vsyncadd [#allocation7], 4294967168  ;;  %v78_v0 = vlaneseq  ;;  %v607_v1 = vmov 0.0   ;;  %v109_v6 = vld [vmem:[#allocation3] sm:$0xff]  ;;  %v200_v7 = vld [vmem:[#allocation3 + $0x8] sm:$0xff]  ;;  %s608_s1 = smov 16  }
  0x27   :  { %58 = vst [vmem:[#allocation2 + $0x80] sm:$0xff] %v607_v1  ;;  %42 = vst [vmem:[#allocation2] sm:$0xff] %v607_v1  ;;  %379 = vmatprep.mubr.f32.mxu0 %v607_v1  ;;  %450 = vmatprep.mubr.f32.mxu1 %v607_v1  ;;  %v115_v9 = vcombine.high %v109_v6, %v109_v6  ;;  %s609_s6 = smov 17   ;;  %v202_v10 = vcombine.high %v200_v7, %v200_v7  ;;  %s610_s7 = smov 15   ;;  %vm311_vm12 = vcmask 588800  }
  0x28   :  { %43 = vst [vmem:[#allocation2 + $0x8] sm:$0xff] %v607_v1  ;;  %44 = vst [vmem:[#allocation2 + $0x10] sm:$0xff] %v607_v1  ;;  %v657_v2 = vand.u32 127, %v78_v0  ;;  %134 = vrot.lane.b32.xlu1 %v109_v6, %s608_s1  ;;  %s611_s8 = smov 1   ;;  %s612_s9 = smov 127  }
  0x29   :  { %45 = vst [vmem:[#allocation2 + $0x18] sm:$0xff] %v607_v1  ;;  %46 = vst [vmem:[#allocation2 + $0x20] sm:$0xff] %v607_v1  ;;  %s613_s10 = smov 113   ;;  %s614_s11 = smov 112  }
  0x2a   :  { %47 = vst [vmem:[#allocation2 + $0x28] sm:$0xff] %v607_v1  ;;  %48 = vst [vmem:[#allocation2 + $0x30] sm:$0xff] %v607_v1  ;;  %v85_v3 = vand.u32 15, %v657_v2  ;;  %v80_v4 = vadd.s32 128, %v657_v2  ;;  %s615_s12 = smov 111   ;;  %vm138_vm4 = vcmp.lt.s32.totalorder %v657_v2, 16 }
  0x2b   :  { %49 = vst [vmem:[#allocation2 + $0x38] sm:$0xff] %v607_v1  ;;  %50 = vst [vmem:[#allocation2 + $0x40] sm:$0xff] %v607_v1  ;;  %vm129_vm5 = vcmp.lt.s32.totalorder %v657_v2, 17  ;;  %vm147_vm6 = vcmp.lt.s32.totalorder %v657_v2, 15  ;;  %vm156_vm7 = vcmp.lt.s32.totalorder %v657_v2, 1  ;;  %vm167_vm8 = vcmp.lt.s32.totalorder %v657_v2, 127 }
  0x2c   :  { %51 = vst [vmem:[#allocation2 + $0x48] sm:$0xff] %v607_v1  ;;  %52 = vst [vmem:[#allocation2 + $0x50] sm:$0xff] %v607_v1  ;;  %vm105_vm0 = vcmp.lt.s32.totalorder %v85_v3, 15  ;;  %v92_v5 = vand.u32 15, %v80_v4  ;;  %136 = vrot.lane.b32.xlu1 %v115_v9, %s608_s1  ;;  %vm107_vm3 = vcmp.gt.s32.totalorder %v85_v3, 0  ;;  %vm176_vm9 = vcmp.lt.s32.totalorder %v657_v2, 113 }
  0x2d   :  { %53 = vst [vmem:[#allocation2 + $0x58] sm:$0xff] %v607_v1  ;;  %54 = vst [vmem:[#allocation2 + $0x60] sm:$0xff] %v607_v1  ;;  %v117_v8 = vsel %vm105_vm0, %v109_v6, 0.0  ;;  %v204_v11 = vsel %vm105_vm0, %v200_v7, 0.0  ;;  %v123_v15 = vsel %vm107_vm3, %v109_v6, 0.0  ;;  %v206_v17 = vsel %vm107_vm3, %v200_v7, 0.0 }
  0x2e   :  { %55 = vst [vmem:[#allocation2 + $0x68] sm:$0xff] %v607_v1  ;;  %56 = vst [vmem:[#allocation2 + $0x70] sm:$0xff] %v607_v1  ;;  %125 = vrot.lane.b32.xlu0 %v117_v8, %s609_s6  ;;  %vm106_vm1 = vcmp.lt.s32.totalorder %v92_v5, 15  ;;  %vm108_vm2 = vcmp.gt.s32.totalorder %v92_v5, 0  ;;  %vm185_vm10 = vcmp.lt.s32.totalorder %v657_v2, 112  ;;  %vm194_vm11 = vcmp.lt.s32.totalorder %v657_v2, 111 }
  0x2f   :  { %57 = vst [vmem:[#allocation2 + $0x78] sm:$0xff] %v607_v1  ;;  %59 = vst [vmem:[#allocation2 + $0x88] sm:$0xff] %v607_v1  ;;  %v205_v12 = vsel %vm106_vm1, %v202_v10, 0.0  ;;  %v118_v13 = vsel %vm106_vm1, %v115_v9, 0.0  ;;  %v124_v14 = vsel %vm108_vm2, %v115_v9, 0.0  ;;  %v207_v16 = vsel %vm108_vm2, %v202_v10, 0.0 }
  0x30   :  { %60 = vst [vmem:[#allocation2 + $0x90] sm:$0xff] %v607_v1  ;;  %61 = vst [vmem:[#allocation2 + $0x98] sm:$0xff] %v607_v1  ;;  %210 = vrot.lane.b32.xlu1 %v205_v12, %s609_s6  ;;  %s616_s13 = smov [#allocation8]  }
  0x31   :  { %62 = vst [vmem:[#allocation2 + $0xa0] sm:$0xff] %v607_v1  ;;  %63 = vst [vmem:[#allocation2 + $0xa8] sm:$0xff] %v607_v1  ;;  %s467_s14 = sshll.u32 %s616_s13, 4  ;;  %s468_s14 = int_to_ptr.vmem [resolvable:$true] %s467_s14 }
  0x32   :  { %64 = vst [vmem:[#allocation2 + $0xb0] sm:$0xff] %v607_v1  ;;  %65 = vst [vmem:[#allocation2 + $0xb8] sm:$0xff] %v607_v1  ;;  %208 = vrot.lane.b32.xlu0 %v204_v11, %s609_s6  ;;  %s575_s15 = scalar_lea.vmem %s468_s14, 512  ;;  %p580_p3 = scmp.lt.s32.totalorder %s468_s14, %s468_s14 }
  0x33   :  { %66 = vst [vmem:[#allocation2 + $0xc0] sm:$0xff] %v607_v1  ;;  %67 = vst [vmem:[#allocation2 + $0xc8] sm:$0xff] %v607_v1  ;;  %p576_p2 = scmp.ne.s32.totalorder %s468_s14, %s575_s15  ;;  %p581_p4 = scmp.lt.s32.totalorder %s575_s15, %s575_s15 }
  0x34   :  { %68 = vst [vmem:[#allocation2 + $0xd0] sm:$0xff] %v607_v1  ;;  %69 = vst [vmem:[#allocation2 + $0xd8] sm:$0xff] %v607_v1  ;;  %218 = vrot.lane.b32.xlu1 %v202_v10, %s608_s1 }
  0x35   :  { %70 = vst [vmem:[#allocation2 + $0xe0] sm:$0xff] %v607_v1  ;;  %71 = vst [vmem:[#allocation2 + $0xe8] sm:$0xff] %v607_v1  ;;  %p582_p5 = por %p581_p4, %p580_p3 }
  0x36   :  { %72 = vst [vmem:[#allocation2 + $0xf0] sm:$0xff] %v607_v1  ;;  %73 = vst [vmem:[#allocation2 + $0xf8] sm:$0xff] %v607_v1  ;;  %127 = vrot.lane.b32.xlu0 %v118_v13, %s609_s6 }
  0x37   :  { %74 = vst [vmem:[#allocation2 + $0x100] sm:$0xff] %v607_v1  ;;  %75 = vst [vmem:[#allocation2 + $0x108] sm:$0xff] %v607_v1  ;;  %p583_p6 = pnand %p582_p5, %p576_p2 }
  0x38   :  { %76 = vst [vmem:[#allocation2 + $0x110] sm:$0xff] %v607_v1  ;;  %77 = vst [vmem:[#allocation2 + $0x118] sm:$0xff] %v607_v1  ;;  %145 = vrot.lane.b32.xlu1 %v124_v14, %s610_s7 }
  0x39   :  { %161 = vst [vmem:[#allocation2 + $0x80] sm:$0xf] %v109_v6  ;;  %240 = vst [vmem:[#allocation2 + $0x90] sm:$0xf] %v200_v7 }
  0x3a   :  { %162 = vst [vmem:[#allocation2 + $0x88] sm:$0xf] %v115_v9  ;;  %241 = vst [vmem:[#allocation2 + $0x98] sm:$0xf] %v202_v10  ;;  %216 = vrot.lane.b32.xlu0 %v200_v7, %s608_s1 }
  0x3c   :  { %154 = vrot.lane.b32.xlu1 %v118_v13, %s611_s8 }
  0x3e   :  { %143 = vrot.lane.b32.xlu0 %v123_v15, %s610_s7 }
  0x40   :  { %226 = vrot.lane.b32.xlu1 %v207_v16, %s610_s7 }
  0x42   :  { %152 = vrot.lane.b32.xlu0 %v117_v8, %s611_s8 }
  0x44   :  { %234 = vrot.lane.b32.xlu1 %v205_v12, %s611_s8 }
  0x46   :  { %224 = vrot.lane.b32.xlu0 %v206_v17, %s610_s7 }
  0x48   :  { %165 = vrot.lane.b32.xlu1 %v124_v14, %s612_s9 }
  0x4a   :  { %232 = vrot.lane.b32.xlu0 %v204_v11, %s611_s8 }
  0x4c   :  { %244 = vrot.lane.b32.xlu1 %v207_v16, %s612_s9 }
  0x4e   :  { %163 = vrot.lane.b32.xlu0 %v123_v15, %s612_s9 }
  0x50   :  { %174 = vrot.lane.b32.xlu1 %v118_v13, %s613_s10 }
  0x52   :  { %242 = vrot.lane.b32.xlu0 %v206_v17, %s612_s9 }
  0x54   :  { %183 = vrot.lane.b32.xlu1 %v115_v9, %s614_s11 }
  0x56   :  { %172 = vrot.lane.b32.xlu0 %v117_v8, %s613_s10 }
  0x58   :  { %252 = vrot.lane.b32.xlu1 %v205_v12, %s613_s10 }
  0x5a   :  { %181 = vrot.lane.b32.xlu0 %v109_v6, %s614_s11 }
  0x5c   :  { %260 = vrot.lane.b32.xlu1 %v202_v10, %s614_s11 }
  0x5e   :  { %250 = vrot.lane.b32.xlu0 %v204_v11, %s613_s10 }
  0x60   :  { %192 = vrot.lane.b32.xlu1 %v124_v14, %s615_s12 }
  0x62   :  { %258 = vrot.lane.b32.xlu0 %v200_v7, %s614_s11 }
  0x64   :  { %268 = vrot.lane.b32.xlu1 %v207_v16, %s615_s12 }
  0x66   :  { %190 = vrot.lane.b32.xlu0 %v123_v15, %s615_s12 }
  0x6a   :  { %266 = vrot.lane.b32.xlu0 %v206_v17, %s615_s12 }
  0x9a   :  { %v135_v18 = vpop.permute.xlu1 %134 }
  0x9e   :  { %v137_v20 = vpop.permute.xlu1 %136 }
  0x9f   :  { %v139_v21 = vsel %vm138_vm4, %v135_v18, %v137_v20  ;;  %v140_v22 = vsel %vm138_vm4, %v137_v20, %v135_v18  ;;  %v292_v20 = vld [vmem:[#allocation2 + $0x88] sm:$0xff] }
  0xa0   :  { %v126_v19 = vpop.permute.xlu0 %125  ;;  %141 = vst [vmem:[#allocation2 + $0x20] sm:$0xf] %v140_v22  ;;  %142 = vst [vmem:[#allocation2 + $0x28] sm:$0xf] %v139_v21  ;;  %v291_v21 = vld [vmem:[#allocation2 + $0x80] sm:$0xff] }
  0xa2   :  { %v211_v24 = vpop.permute.xlu1 %210 }
  0xa4   :  { %v209_v23 = vpop.permute.xlu0 %208 }
  0xa5   :  { %v212_v25 = vsel %vm129_vm5, %v209_v23, %v211_v24  ;;  %v213_v26 = vsel %vm129_vm5, %v211_v24, %v209_v23 }
  0xa6   :  { %214 = vst [vmem:[#allocation2 + $0x10] sm:$0xf] %v213_v26  ;;  %215 = vst [vmem:[#allocation2 + $0x18] sm:$0xf] %v212_v25  ;;  %v219_v30 = vpop.permute.xlu1 %218 }
  0xa7   :  { %v280_v36 = vld [vmem:[#allocation2 + $0x28] sm:$0xff]  ;;  %v279_v41 = vld [vmem:[#allocation2 + $0x20] sm:$0xff] }
  0xa8   :  { %v128_v27 = vpop.permute.xlu0 %127 }
  0xa9   :  { %v130_v28 = vsel %vm129_vm5, %v126_v19, %v128_v27  ;;  %v131_v29 = vsel %vm129_vm5, %v128_v27, %v126_v19 }
  0xaa   :  { %132 = vst [vmem:[#allocation2] sm:$0xf] %v131_v29  ;;  %133 = vst [vmem:[#allocation2 + $0x8] sm:$0xf] %v130_v28  ;;  %v146_v34 = vpop.permute.xlu1 %145 }
  0xac   :  { %v217_v31 = vpop.permute.xlu0 %216 }
  0xad   :  { %v220_v32 = vsel %vm138_vm4, %v217_v31, %v219_v30  ;;  %v221_v33 = vsel %vm138_vm4, %v219_v30, %v217_v31  ;;  %v278_v46 = vld [vmem:[#allocation2 + $0x18] sm:$0xff]  ;;  %v277_v50 = vld [vmem:[#allocation2 + $0x10] sm:$0xff] }
  0xae   :  { %222 = vst [vmem:[#allocation2 + $0x30] sm:$0xf] %v221_v33  ;;  %223 = vst [vmem:[#allocation2 + $0x38] sm:$0xf] %v220_v32  ;;  %v155_v44 = vpop.permute.xlu1 %154  ;;  %v294_v30 = vld [vmem:[#allocation2 + $0x98] sm:$0xff]  ;;  %v293_v31 = vld [vmem:[#allocation2 + $0x90] sm:$0xff] }
  0xb0   :  { %v144_v35 = vpop.permute.xlu0 %143 }
  0xb1   :  { %v148_v37 = vsel %vm147_vm6, %v144_v35, %v146_v34  ;;  %v149_v38 = vsel %vm147_vm6, %v146_v34, %v144_v35  ;;  %v276_v39 = vld [vmem:[#allocation2 + $0x8] sm:$0xff]  ;;  %v275_v40 = vld [vmem:[#allocation2] sm:$0xff] }
  0xb2   :  { %150 = vst [vmem:[#allocation2 + $0x40] sm:$0xf] %v149_v38  ;;  %151 = vst [vmem:[#allocation2 + $0x48] sm:$0xf] %v148_v37  ;;  %v482_v42 = vpack.c.bf16 %v280_v36, %v276_v39  ;;  %v484_v43 = vpack.c.bf16 %v279_v41, %v275_v40  ;;  %v227_v54 = vpop.permute.xlu1 %226 }
  0xb4   :  { %v153_v45 = vpop.permute.xlu0 %152  ;;  %483 = vmatprep.subr.bf16.mxu0 %v482_v42 }
  0xb5   :  { %v157_v47 = vsel %vm156_vm7, %v153_v45, %v155_v44  ;;  %v158_v48 = vsel %vm156_vm7, %v155_v44, %v153_v45  ;;  %485 = vmatpush1.bf16.msra.mxu0 %v484_v43  ;;  %v282_v49 = vld [vmem:[#allocation2 + $0x38] sm:$0xff]  ;;  %v281_v51 = vld [vmem:[#allocation2 + $0x30] sm:$0xff] }
  0xb6   :  { %159 = vst [vmem:[#allocation2 + $0x60] sm:$0xf] %v158_v48  ;;  %160 = vst [vmem:[#allocation2 + $0x68] sm:$0xf] %v157_v47  ;;  %v498_v52 = vpack.c.bf16 %v282_v49, %v278_v46  ;;  %v500_v53 = vpack.c.bf16 %v281_v51, %v277_v50  ;;  %v235_v58 = vpop.permute.xlu1 %234 }
  0xb8   :  { %v225_v55 = vpop.permute.xlu0 %224  ;;  %499 = vmatprep.subr.bf16.mxu1 %v498_v52 }
  0xb9   :  { %v228_v56 = vsel %vm147_vm6, %v225_v55, %v227_v54  ;;  %v229_v57 = vsel %vm147_vm6, %v227_v54, %v225_v55  ;;  %501 = vmatpush1.bf16.msra.mxu1 %v500_v53  ;;  %v284_v60 = vld [vmem:[#allocation2 + $0x48] sm:$0xff]  ;;  %v283_v0 = vld [vmem:[#allocation2 + $0x40] sm:$0xff] }
  0xba   :  { %230 = vst [vmem:[#allocation2 + $0x50] sm:$0xf] %v229_v57  ;;  %231 = vst [vmem:[#allocation2 + $0x58] sm:$0xf] %v228_v56  ;;  %v166_v5 = vpop.permute.xlu1 %165 }
  0xbc   :  { %v233_v59 = vpop.permute.xlu0 %232 }
  0xbd   :  { %v236_v61 = vsel %vm156_vm7, %v233_v59, %v235_v58  ;;  %v237_v62 = vsel %vm156_vm7, %v235_v58, %v233_v59  ;;  %v288_v63 = vld [vmem:[#allocation2 + $0x68] sm:$0xff]  ;;  %v287_v1 = vld [vmem:[#allocation2 + $0x60] sm:$0xff] }
  0xbe   :  { %238 = vst [vmem:[#allocation2 + $0x70] sm:$0xf] %v237_v62  ;;  %239 = vst [vmem:[#allocation2 + $0x78] sm:$0xf] %v236_v61  ;;  %v486_v3 = vpack.c.bf16 %v288_v63, %v284_v60  ;;  %v488_v4 = vpack.c.bf16 %v287_v1, %v283_v0  ;;  %v245_v9 = vpop.permute.xlu1 %244 }
  0xc0   :  { %v164_v6 = vpop.permute.xlu0 %163  ;;  %487 = vmatprep.subr.bf16.mxu0 %v486_v3 }
  0xc1   :  { %v168_v7 = vsel %vm167_vm8, %v164_v6, %v166_v5  ;;  %v169_v8 = vsel %vm167_vm8, %v166_v5, %v164_v6  ;;  %489 = vmatpush1.bf16.msra.mxu0 %v488_v4  ;;  %v286_v11 = vld [vmem:[#allocation2 + $0x58] sm:$0xff]  ;;  %v285_v15 = vld [vmem:[#allocation2 + $0x50] sm:$0xff] }
  0xc2   :  { %170 = vst [vmem:[#allocation2 + $0xa0] sm:$0xf] %v168_v7  ;;  %171 = vst [vmem:[#allocation2 + $0xa8] sm:$0xf] %v169_v8  ;;  %v175_v19 = vpop.permute.xlu1 %174  ;;  %v274_v5 = vld [vmem:[#allocation6] sm:$0xff] }
  0xc4   :  { %v243_v10 = vpop.permute.xlu0 %242 }
  0xc5   :  { %v246_v12 = vsel %vm167_vm8, %v243_v10, %v245_v9  ;;  %v247_v13 = vsel %vm167_vm8, %v245_v9, %v243_v10  ;;  %v290_v14 = vld [vmem:[#allocation2 + $0x78] sm:$0xff]  ;;  %v289_v16 = vld [vmem:[#allocation2 + $0x70] sm:$0xff] }
  0xc6   :  { %248 = vst [vmem:[#allocation2 + $0xb0] sm:$0xf] %v246_v12  ;;  %249 = vst [vmem:[#allocation2 + $0xb8] sm:$0xf] %v247_v13  ;;  %v502_v17 = vpack.c.bf16 %v290_v14, %v286_v11  ;;  %v504_v18 = vpack.c.bf16 %v289_v16, %v285_v15  ;;  %v184_v29 = vpop.permute.xlu1 %183 }
  0xc8   :  { %v173_v22 = vpop.permute.xlu0 %172  ;;  %503 = vmatprep.subr.bf16.mxu1 %v502_v17 }
  0xc9   :  { %v177_v23 = vsel %vm176_vm9, %v173_v22, %v175_v19  ;;  %v178_v24 = vsel %vm176_vm9, %v175_v19, %v173_v22  ;;  %505 = vmatpush1.bf16.msra.mxu1 %v504_v18  ;;  %v296_v25 = vld [vmem:[#allocation2 + $0xa8] sm:$0xff]  ;;  %v295_v26 = vld [vmem:[#allocation2 + $0xa0] sm:$0xff] }
  0xca   :  { %179 = vst [vmem:[#allocation2 + $0xc0] sm:$0xf] %v177_v23  ;;  %180 = vst [vmem:[#allocation2 + $0xc8] sm:$0xf] %v178_v24  ;;  %v490_v27 = vpack.c.bf16 %v296_v25, %v292_v20  ;;  %v492_v28 = vpack.c.bf16 %v295_v26, %v291_v21  ;;  %v253_v39 = vpop.permute.xlu1 %252 }
  0xcc   :  { %v182_v32 = vpop.permute.xlu0 %181  ;;  %491 = vmatprep.subr.bf16.mxu0 %v490_v27 }
  0xcd   :  { %v186_v33 = vsel %vm185_vm10, %v182_v32, %v184_v29  ;;  %v187_v34 = vsel %vm185_vm10, %v184_v29, %v182_v32  ;;  %493 = vmatpush1.bf16.msra.mxu0 %v492_v28  ;;  %v298_v35 = vld [vmem:[#allocation2 + $0xb8] sm:$0xff]  ;;  %v297_v36 = vld [vmem:[#allocation2 + $0xb0] sm:$0xff] }
  0xce   :  { %188 = vst [vmem:[#allocation2 + $0xe0] sm:$0xf] %v186_v33  ;;  %189 = vst [vmem:[#allocation2 + $0xe8] sm:$0xf] %v187_v34  ;;  %v506_v37 = vpack.c.bf16 %v298_v35, %v294_v30  ;;  %v508_v38 = vpack.c.bf16 %v297_v36, %v293_v31  ;;  %v261_v43 = vpop.permute.xlu1 %260 }
  0xd0   :  { %v251_v40 = vpop.permute.xlu0 %250  ;;  %507 = vmatprep.subr.bf16.mxu1 %v506_v37 }
  0xd1   :  { %v254_v41 = vsel %vm176_vm9, %v251_v40, %v253_v39  ;;  %v255_v42 = vsel %vm176_vm9, %v253_v39, %v251_v40  ;;  %509 = vmatpush1.bf16.msra.mxu1 %v508_v38  ;;  %v300_v45 = vld [vmem:[#allocation2 + $0xc8] sm:$0xff]  ;;  %v299_v49 = vld [vmem:[#allocation2 + $0xc0] sm:$0xff] }
  0xd2   :  { %256 = vst [vmem:[#allocation2 + $0xd0] sm:$0xf] %v254_v41  ;;  %257 = vst [vmem:[#allocation2 + $0xd8] sm:$0xf] %v255_v42  ;;  %v193_v53 = vpop.permute.xlu1 %192 }
  0xd4   :  { %v259_v44 = vpop.permute.xlu0 %258 }
  0xd5   :  { %v262_v46 = vsel %vm185_vm10, %v259_v44, %v261_v43  ;;  %v263_v47 = vsel %vm185_vm10, %v261_v43, %v259_v44  ;;  %v304_v48 = vld [vmem:[#allocation2 + $0xe8] sm:$0xff]  ;;  %v303_v50 = vld [vmem:[#allocation2 + $0xe0] sm:$0xff] }
  0xd6   :  { %264 = vst [vmem:[#allocation2 + $0xf0] sm:$0xf] %v262_v46  ;;  %265 = vst [vmem:[#allocation2 + $0xf8] sm:$0xf] %v263_v47  ;;  %v494_v51 = vpack.c.bf16 %v304_v48, %v300_v45  ;;  %v496_v52 = vpack.c.bf16 %v303_v50, %v299_v49  ;;  %v269_v57 = vpop.permute.xlu1 %268 }
  0xd8   :  { %v191_v54 = vpop.permute.xlu0 %190  ;;  %495 = vmatprep.subr.bf16.mxu0 %v494_v51 }
  0xd9   :  { %v195_v55 = vsel %vm194_vm11, %v191_v54, %v193_v53  ;;  %v196_v56 = vsel %vm194_vm11, %v193_v53, %v191_v54  ;;  %497 = vmatpush1.bf16.msra.mxu0 %v496_v52  ;;  %v302_v59 = vld [vmem:[#allocation2 + $0xd8] sm:$0xff]  ;;  %v301_v63 = vld [vmem:[#allocation2 + $0xd0] sm:$0xff] }
  0xda   :  { %197 = vst [vmem:[#allocation2 + $0x100] sm:$0xf] %v195_v55  ;;  %198 = vst [vmem:[#allocation2 + $0x108] sm:$0xf] %v196_v56 }
  0xdc   :  { %v267_v58 = vpop.permute.xlu0 %266 }
  0xdd   :  { %v270_v60 = vsel %vm194_vm11, %v267_v58, %v269_v57  ;;  %v271_v61 = vsel %vm194_vm11, %v269_v57, %v267_v58  ;;  %v306_v62 = vld [vmem:[#allocation2 + $0xf8] sm:$0xff]  ;;  %v305_v0 = vld [vmem:[#allocation2 + $0xf0] sm:$0xff] }
  0xde   :  { %272 = vst [vmem:[#allocation2 + $0x110] sm:$0xf] %v270_v60  ;;  %273 = vst [vmem:[#allocation2 + $0x118] sm:$0xf] %v271_v61  ;;  %v510_v2 = vpack.c.bf16 %v306_v62, %v302_v59  ;;  %v512_v1 = vpack.c.bf16 %v305_v0, %v301_v63 }
  0xe0   :  { %511 = vmatprep.subr.bf16.mxu1 %v510_v2 }
  0xe1   :  { %513 = vmatpush1.bf16.msra.mxu1 %v512_v1  ;;  %v308_v3 = vld [vmem:[#allocation2 + $0x108] sm:$0xff]  ;;  %v307_v4 = vld [vmem:[#allocation2 + $0x100] sm:$0xff] }
  0xe2   :  { %331 = vmatprep.subr.mxu0 %v308_v3 }
  0xe3   :  { %332 = vmatpush1.msra.mxu0 %v307_v4 }
  0xe4   :  { %480 = vmatmul.mubr.msk.f32.vlgmr.msra.gmra.mrb[0].mxu0 %vm311_vm12, %v274_v5 }
  0xe5   :  { %v310_v6 = vld [vmem:[#allocation2 + $0x118] sm:$0xff]  ;;  %v309_v7 = vld [vmem:[#allocation2 + $0x110] sm:$0xff] }
  0xe6   :  { %402 = vmatprep.subr.mxu1 %v310_v6 }
  0xe7   :  { %403 = vmatpush1.msra.mxu1 %v309_v7 }
  0xe8   :  { %481 = vmatmul.mubr.msk.f32.vlgmr.msra.gmra.mrb[0].mxu1 %vm311_vm12, %v274_v5 }
 0x1b7   :  { %v381_v8 = vpop.f32.mrb[0].mxu0 }
 0x1b8   :  { %457 = vst [vmem:[#allocation8] sm:$0xff] %v381_v8  ;;  %v383_v9 = vpop.f32.mrb[1].mxu0 }
 0x1b9   :  { %458 = vst [vmem:[#allocation8 + $0x8] sm:$0xff] %v383_v9 }
 0x1bb   :  { %v452_v10 = vpop.f32.mrb[0].mxu1 }
 0x1bc   :  { %460 = vst [vmem:[#allocation8 + $0x10] sm:$0xff] %v452_v10  ;;  %v454_v11 = vpop.f32.mrb[1].mxu1 }
 0x1bd   :  { %461 = vst [vmem:[#allocation8 + $0x18] sm:$0xff] %v454_v11 }
 0x1be   :  { %586 = shalt.err (!%p583_p6)
}
 0x1bf   :  { %s587_s18 = scalar_lea.hbm %s728_s2, 512 }
 0x1c0   :  { %p588_p7 = scmp.ne.s32.totalorder %s728_s2, %s587_s18  ;;  %p591_p8 = scmp.lt.u32.totalorder %s587_s18, %s728_s2 }
 0x1c2   :  { %p593_p9 = pnand %p591_p8, %p588_p7 }
 0x1c4   :  { %596 = shalt.err (!%p593_p9)
}
 0x1c5   :  { %s617_s23 = smov 256  }
 0x1c6   :  { %473 = dma.vmem_to_hbm [thread:$0]  %s468_s14, 512, %s728_s2, [#allocation5], %s617_s23, %s617_s23, %s608_s1  }
 0x1c7   :  { %601 = dma.done.wait [#allocation5], 512  }
 0x1c8   :  { %602 = vsyncadd [#allocation5], 4294966784 }
 0x1c9   :  { %477 = vsyncpa [#allocation4], 1 }
 0x1ca   :  { %478 = vsyncpa [#allocation7], 1 }
 0x1cb   :  { %479 = vsyncpa [#allocation5], 1 }

</bundles_post_ra>
